<compile_context>
chip_gen: v7x
topology: tpu7x:2x2x1
jax: 0.10.0
libtpu: 0.0.40
codegen_flags: <defaults>
</compile_context>

<pallas_src>
import jax
import jax.numpy as jnp
from jax.experimental import pallas as pl
from jax.experimental.pallas import tpu as pltpu

LANE = 128
SUBLANE = 16          # multiple of both f32 (8) and bf16 (16) sublane tiling


def _round_up(x, m):
    return (x + m - 1) // m * m


def _choose_tm(B, tm_max):
    """Pick (tm, padded_B).

    Prefers tiles that (a) divide B exactly (no padding pass over x),
    (b) are multiples of SUBLANE (layout-legal for f32 and bf16), and
    (c) give the grid >= 4 steps on large batches (>= 2 pipelined steps per
    TensorCore on v7x).  Small or ragged batches fall back to a single
    full-extent tile, which is always layout-legal and needs no padding.
    """
    if B <= 2 * SUBLANE:
        return B, B                                  # tiny batch: one tile
    # Cap tile so large batches get at least ~4 grid steps.
    cap = max(SUBLANE, min(tm_max, ((B // 4) // SUBLANE * SUBLANE) or SUBLANE))
    tm = cap - cap % SUBLANE
    while tm >= SUBLANE:
        if B % tm == 0:
            return tm, B                             # exact divisor: no pad
        tm -= SUBLANE
    if B <= tm_max:
        return B, B                                  # ragged but small: one tile
    # Ragged large batch (rare): pad to a multiple of the capped tile.
    tm = cap - cap % SUBLANE
    return tm, _round_up(B, tm)


def mlp_kernel(x_ref, w1_ref, b1_ref, w2_ref, b2_ref, o_ref):
    # Cast x to the matmul feed dtype here (VPU has slack); the wrapper never
    # makes a separate HBM astype pass over x.
    x = x_ref[...].astype(w1_ref.dtype)
    # Layer 1 on the MXU, f32 accumulation; bias + ReLU in f32 on the VPU.
    h = jnp.dot(x, w1_ref[...], preferred_element_type=jnp.float32)
    h = jnp.maximum(h + b1_ref[...], 0.0)
    # Layer 2 on the MXU, f32 accumulation.
    y = jnp.dot(h.astype(w2_ref.dtype), w2_ref[...],
                preferred_element_type=jnp.float32)
    y = y + b2_ref[...]
    # Numerically stable exact sigmoid: exp argument is always <= 0 (no inf),
    # plain divide instead of approx vrcp (EUP is nowhere near the bottleneck).
    z = jnp.exp(-jnp.abs(y))
    sig = jnp.where(y >= 0, 1.0 / (1.0 + z), z / (1.0 + z))
    o_ref[...] = sig.astype(o_ref.dtype)


def mlp_forward(x, w1, b1, w2, b2, *, tm_max=2048, use_bf16=True, out_dtype=None):
    """x: (B, D_in); w1: (D_in, H); b1: (1, H); w2: (H, D_out); b2: (1, D_out).

    out_dtype defaults to x.dtype; pass jnp.bfloat16 to halve the writeback
    stream (sigmoid outputs are in [0, 1]).
    """
    B, D_in = x.shape
    H, D_out = w2.shape
    out_dtype = x.dtype if out_dtype is None else jnp.dtype(out_dtype)

    # Weights/biases are tiny (~25 KiB) and stay resident in VMEM for the whole
    # grid, so casting them once in the wrapper is free.
    mm_dtype = jnp.bfloat16 if use_bf16 else x.dtype
    w1_mm = w1.astype(mm_dtype)
    w2_mm = w2.astype(mm_dtype)
    b1_f = b1.reshape(1, H).astype(jnp.float32)
    b2_f = b2.reshape(1, D_out).astype(jnp.float32)

    tm, B_p = _choose_tm(B, tm_max)
    if B_p != B:                                    # rare path: ragged large batch
        x = jnp.pad(x, ((0, B_p - B), (0, 0)))
    grid = (B_p // tm,)

    # VMEM budget from the true footprint: double-buffered x/out tiles,
    # resident weights (counted x2 for the revolving buffers), f32 hidden /
    # logits scratch, ~25% headroom + 1 MiB; cap well below v7x's 64 MiB/core.
    mm_b = jnp.dtype(mm_dtype).itemsize
    x_tile = tm * D_in * x.dtype.itemsize
    o_tile = tm * D_out * jnp.dtype(out_dtype).itemsize
    scratch = tm * (H + max(D_out, LANE)) * 4
    w_res = (D_in * H + H * D_out) * mm_b + (H + D_out) * 4
    vmem_limit = int(1.25 * (2 * (x_tile + o_tile) + 2 * w_res + scratch)) + (1 << 20)
    vmem_limit = int(min(max(vmem_limit, 8 << 20), 48 << 20))

    out_p = pl.pallas_call(
        mlp_kernel,
        out_shape=jax.ShapeDtypeStruct((B_p, D_out), out_dtype),
        grid_spec=pltpu.PrefetchScalarGridSpec(
            num_scalar_prefetch=0,
            grid=grid,
            in_specs=[
                pl.BlockSpec((tm, D_in), lambda i: (i, 0)),   # streamed batch tiles
                pl.BlockSpec((D_in, H), lambda i: (0, 0)),    # resident weights
                pl.BlockSpec((1, H), lambda i: (0, 0)),
                pl.BlockSpec((H, D_out), lambda i: (0, 0)),
                pl.BlockSpec((1, D_out), lambda i: (0, 0)),
            ],
            out_specs=pl.BlockSpec((tm, D_out), lambda i: (i, 0)),
        ),
        compiler_params=pltpu.CompilerParams(
            dimension_semantics=("parallel",),   # megacore-shard batch on v7x
            vmem_limit_bytes=vmem_limit,
        ),
    )(x, w1_mm, b1_f, w2_mm, b2_f)

    return out_p if B_p == B else out_p[:B]


if __name__ == "__main__":
    # Small shapes consistent with the module's forward.
    batch = 8
    input_dim = 32
    hidden = 128          # fixed by the module definition
    output_dim = 16

    key = jax.random.PRNGKey(0)
    kx, k1, kb1, k2, kb2 = jax.random.split(key, 5)

    x = jax.random.normal(kx, (batch, input_dim), dtype=jnp.float32)

    # Deterministic parameter init (uniform, PyTorch-Linear-like fan_in bound),
    # stored as (in, out) for the x @ W convention.
    bound1 = 1.0 / (input_dim ** 0.5)
    w1 = jax.random.uniform(k1, (input_dim, hidden), jnp.float32, -bound1, bound1)
    b1 = jax.random.uniform(kb1, (1, hidden), jnp.float32, -bound1, bound1)

    bound2 = 1.0 / (hidden ** 0.5)
    w2 = jax.random.uniform(k2, (hidden, output_dim), jnp.float32, -bound2, bound2)
    b2 = jax.random.uniform(kb2, (1, output_dim), jnp.float32, -bound2, bound2)

    # Pure-JAX reference.
    ref = jax.nn.sigmoid(jnp.maximum(x @ w1 + b1, 0.0) @ w2 + b2)

    # f32 MXU path: exact sigmoid, tight tolerance.
    out_f32 = mlp_forward(x, w1, b1, w2, b2, use_bf16=False)
    jax.block_until_ready(out_f32)
    assert out_f32.shape == (batch, output_dim)
    assert jnp.allclose(out_f32, ref, atol=1e-5, rtol=1e-5), \
        float(jnp.max(jnp.abs(out_f32 - ref)))

    # bf16 MXU-feed path (default; x cast in-kernel, f32 accumulate).
    out_bf16 = mlp_forward(x, w1, b1, w2, b2, use_bf16=True)
    jax.block_until_ready(out_bf16)
    assert out_bf16.shape == (batch, output_dim)
    assert jnp.allclose(out_bf16, ref, atol=3e-2, rtol=3e-2), \
        float(jnp.max(jnp.abs(out_bf16 - ref)))

    print("KERNEL_OK")
</pallas_src>

<mosaic_0001>
module attributes {stable_mosaic.version = 11 : i64} {
  func.func @mlp_kernel(%arg0: i32, %arg1: memref<8x32xf32, #tpu.memory_space<vmem>>, %arg2: memref<32x128xf32, #tpu.memory_space<vmem>>, %arg3: memref<1x128xf32, #tpu.memory_space<vmem>>, %arg4: memref<128x16xf32, #tpu.memory_space<vmem>>, %arg5: memref<1x16xf32, #tpu.memory_space<vmem>>, %arg6: memref<8x16xf32, #tpu.memory_space<vmem>>) attributes {dimension_semantics = [#tpu.dimension_semantics<parallel>], iteration_bounds = array<i64: 1>, scalar_prefetch = 0 : i64, scratch_operands = 0 : i64, tpu.core_type = #tpu.core_type<tc>, window_params = [{transform_indices = @transform_0, window_bounds = array<i64: 8, 32>}, {pipeline_mode = #tpu.pipeline_mode<synchronous>, transform_indices = @transform_1, window_bounds = array<i64: 32, 128>}, {pipeline_mode = #tpu.pipeline_mode<synchronous>, transform_indices = @transform_2, window_bounds = array<i64: 1, 128>}, {pipeline_mode = #tpu.pipeline_mode<synchronous>, transform_indices = @transform_3, window_bounds = array<i64: 128, 16>}, {pipeline_mode = #tpu.pipeline_mode<synchronous>, transform_indices = @transform_4, window_bounds = array<i64: 1, 16>}, {transform_indices = @transform_5, window_bounds = array<i64: 8, 16>}]} {
    %c0 = arith.constant 0 : index
    %c0_0 = arith.constant 0 : index
    %0 = vector.load %arg1[%c0, %c0_0] : memref<8x32xf32, #tpu.memory_space<vmem>>, vector<8x32xf32>
    %c0_1 = arith.constant 0 : index
    %c0_2 = arith.constant 0 : index
    %1 = vector.load %arg2[%c0_1, %c0_2] : memref<32x128xf32, #tpu.memory_space<vmem>>, vector<32x128xf32>
    %cst = arith.constant dense<0.000000e+00> : vector<8x128xf32>
    %2 = tpu.matmul %0, %1, %cst {dimension_numbers = #tpu.dot_dimension_numbers<[1], [0], [0], [1], [0, 0, 1, 1], [], []>} : vector<8x32xf32>, vector<32x128xf32>, vector<8x128xf32> -> vector<8x128xf32>
    %c0_3 = arith.constant 0 : index
    %c0_4 = arith.constant 0 : index
    %3 = vector.load %arg3[%c0_3, %c0_4] : memref<1x128xf32, #tpu.memory_space<vmem>>, vector<1x128xf32>
    %4 = vector.broadcast %3 : vector<1x128xf32> to vector<8x128xf32>
    %5 = arith.addf %2, %4 : vector<8x128xf32>
    %cst_5 = arith.constant 0.000000e+00 : f32
    %6 = vector.broadcast %cst_5 : f32 to vector<8x128xf32>
    %7 = arith.maximumf %5, %6 : vector<8x128xf32>
    %c0_6 = arith.constant 0 : index
    %c0_7 = arith.constant 0 : index
    %8 = vector.load %arg4[%c0_6, %c0_7] : memref<128x16xf32, #tpu.memory_space<vmem>>, vector<128x16xf32>
    %cst_8 = arith.constant dense<0.000000e+00> : vector<8x16xf32>
    %9 = tpu.matmul %7, %8, %cst_8 {dimension_numbers = #tpu.dot_dimension_numbers<[1], [0], [0], [1], [0, 0, 1, 1], [], []>} : vector<8x128xf32>, vector<128x16xf32>, vector<8x16xf32> -> vector<8x16xf32>
    %c0_9 = arith.constant 0 : index
    %c0_10 = arith.constant 0 : index
    %10 = vector.load %arg5[%c0_9, %c0_10] : memref<1x16xf32, #tpu.memory_space<vmem>>, vector<1x16xf32>
    %11 = vector.broadcast %10 : vector<1x16xf32> to vector<8x16xf32>
    %12 = arith.addf %9, %11 : vector<8x16xf32>
    %13 = math.absf %12 : vector<8x16xf32>
    %cst_11 = arith.constant 0.000000e+00 : f32
    %14 = vector.broadcast %cst_11 : f32 to vector<8x16xf32>
    %15 = arith.subf %14, %13 : vector<8x16xf32>
    %16 = math.exp %15 : vector<8x16xf32>
    %cst_12 = arith.constant 0.000000e+00 : f32
    %17 = vector.broadcast %cst_12 : f32 to vector<8x16xf32>
    %18 = arith.cmpf oge, %12, %17 : vector<8x16xf32>
    %cst_13 = arith.constant 1.000000e+00 : f32
    %19 = vector.broadcast %cst_13 : f32 to vector<8x16xf32>
    %20 = arith.addf %19, %16 : vector<8x16xf32>
    %cst_14 = arith.constant 1.000000e+00 : f32
    %21 = vector.broadcast %cst_14 : f32 to vector<8x16xf32>
    %22 = arith.divf %21, %20 : vector<8x16xf32>
    %cst_15 = arith.constant 1.000000e+00 : f32
    %23 = vector.broadcast %cst_15 : f32 to vector<8x16xf32>
    %24 = arith.addf %23, %16 : vector<8x16xf32>
    %25 = arith.divf %16, %24 : vector<8x16xf32>
    %26 = arith.select %18, %22, %25 : vector<8x16xi1>, vector<8x16xf32>
    %c0_16 = arith.constant 0 : index
    %c0_17 = arith.constant 0 : index
    %27 = vector.load %arg6[%c0_16, %c0_17] : memref<8x16xf32, #tpu.memory_space<vmem>>, vector<8x16xf32>
    tpu.vector_store %arg6[%c0_16, %c0_17], %26 {strides = array<i32>} : memref<8x16xf32, #tpu.memory_space<vmem>>, vector<8x16xf32>,
    return
  }
  func.func @transform_0(%arg0: i32) -> (i32, i32) {
    %c0_i32 = arith.constant 0 : i32
    %c0_i32_0 = arith.constant 0 : i32
    return %arg0, %c0_i32 : i32, i32
  }
  func.func @transform_1(%arg0: i32) -> (i32, i32) {
    %c0_i32 = arith.constant 0 : i32
    %c0_i32_0 = arith.constant 0 : i32
    %c0_i32_1 = arith.constant 0 : i32
    return %c0_i32, %c0_i32_0 : i32, i32
  }
  func.func @transform_2(%arg0: i32) -> (i32, i32) {
    %c0_i32 = arith.constant 0 : i32
    %c0_i32_0 = arith.constant 0 : i32
    %c0_i32_1 = arith.constant 0 : i32
    return %c0_i32, %c0_i32_0 : i32, i32
  }
  func.func @transform_3(%arg0: i32) -> (i32, i32) {
    %c0_i32 = arith.constant 0 : i32
    %c0_i32_0 = arith.constant 0 : i32
    %c0_i32_1 = arith.constant 0 : i32
    return %c0_i32, %c0_i32_0 : i32, i32
  }
  func.func @transform_4(%arg0: i32) -> (i32, i32) {
    %c0_i32 = arith.constant 0 : i32
    %c0_i32_0 = arith.constant 0 : i32
    %c0_i32_1 = arith.constant 0 : i32
    return %c0_i32, %c0_i32_0 : i32, i32
  }
  func.func @transform_5(%arg0: i32) -> (i32, i32) {
    %c0_i32 = arith.constant 0 : i32
    %c0_i32_0 = arith.constant 0 : i32
    return %arg0, %c0_i32 : i32, i32
  }
}

</mosaic_0001>

<bundles_post_ra>
// kernel: tpu_custom_call.1
= control target key start
LH: loop header
LB: loop body
LE: loop exit
PB: predicated region body
PF: predicated region fallthrough
CT: control target
= control target key end

     0   :  { %v360_v3 = vmov 0.0|0.0   ;;  %vm361_vm0 = vmmov 0   ;;  %v362_v6 = vmov 0.0   ;;  %s475_s0 = inlined_call_operand.vmem [shape: f32[8,32], index: 0, kind: input, shape index: {}]   ;;  %s476_s1 = inlined_call_operand.vmem [shape: f32[32,128], index: 1, kind: input, shape index: {}]   ;;  %s477_s2 = inlined_call_operand.vmem [shape: f32[1,128], index: 2, kind: input, shape index: {}]   ;;  %s478_s3 = inlined_call_operand.vmem [shape: f32[128,16], index: 3, kind: input, shape index: {}]   ;;  %s479_s4 = inlined_call_operand.vmem [shape: f32[1,16], index: 4, kind: input, shape index: {}]   ;;  %s480_s5 = inlined_call_operand.hbm [shape: f32[8,16], index: 5, kind: output, shape index: {}]  }
   0x1   :  { %v22_v0 = vld [vmem:[%s476_s1] sm:$0xff]  ;;  %v23_v1 = vld [vmem:[%s476_s1 + $0x8] sm:$0xff]  ;;  %v24_v2 = vld [vmem:[%s476_s1 + $0x10] sm:$0xff]  ;;  %298 = vmatprep.subr.bf16.mxu0 %v360_v3  ;;  %260 = vmatprep.mubr.msk.f32.mxu0 %vm361_vm0, %v362_v6 }
   0x2   :  { %v299_v4 = vpack.c.bf16 %v23_v1, %v22_v0  ;;  %v25_v5 = vld [vmem:[%s476_s1 + $0x18] sm:$0xff]  ;;  %v108_v7 = vld [vmem:[%s478_s3] sm:$0xff]  ;;  %304 = vmatprep.subr.bf16.mxu1 %v360_v3  ;;  %v109_v8 = vld [vmem:[%s478_s3 + $0x8] sm:$0xff]  ;;  %295 = vmatprep.mubr.msk.f32.mxu1 %vm361_vm0, %v362_v6 }
   0x3   :  { %v110_v9 = vld [vmem:[%s478_s3 + $0x10] sm:$0xff]  ;;  %v111_v10 = vld [vmem:[%s478_s3 + $0x18] sm:$0xff]  ;;  %v302_v11 = vpack.c.bf16 %v25_v5, %v24_v2  ;;  %v305_v12 = vpack.c.bf16 %v109_v8, %v108_v7  ;;  %v112_v14 = vld [vmem:[%s478_s3 + $0x20] sm:$0xff] }
   0x4   :  { %300 = vmatpush3.bf16.msra.mxu0 %v299_v4  ;;  %v308_v13 = vpack.c.bf16 %v111_v10, %v110_v9  ;;  %v113_v15 = vld [vmem:[%s478_s3 + $0x28] sm:$0xff] }
   0x5   :  { %301 = vmatprep.subr.bf16.mxu0 %v360_v3  ;;  %306 = vmatpush3.bf16.msra.mxu1 %v305_v12 }
   0x6   :  { %307 = vmatprep.subr.bf16.mxu1 %v360_v3 }
   0x7   :  { %10 = vsyncpa [#allocation3], 0  ;;  %v21_v16 = vld [vmem:[%s475_s0] sm:$0xff]  ;;  %vm33_vm1 = vcmask 261120   ;;  %v311_v17 = vpack.c.bf16 %v113_v15, %v112_v14  ;;  %v114_v18 = vld [vmem:[%s478_s3 + $0x30] sm:$0xff]  ;;  %vm211_vm2 = vcmask 130048  }
   0x8   :  { %303 = vmatpush3.bf16.msra.mxu0 %v302_v11  ;;  %v115_v19 = vld [vmem:[%s478_s3 + $0x38] sm:$0xff]  ;;  %v116_v21 = vld [vmem:[%s478_s3 + $0x40] sm:$0xff]  ;;  %v117_v22 = vld [vmem:[%s478_s3 + $0x48] sm:$0xff] }
   0x9   :  { %309 = vmatpush3.bf16.msra.mxu1 %v308_v13  ;;  %v314_v20 = vpack.c.bf16 %v115_v19, %v114_v18  ;;  %v317_v23 = vpack.c.bf16 %v117_v22, %v116_v21  ;;  %v118_v24 = vld [vmem:[%s478_s3 + $0x50] sm:$0xff]  ;;  %v119_v25 = vld [vmem:[%s478_s3 + $0x58] sm:$0xff]  ;;  %v120_v27 = vld [vmem:[%s478_s3 + $0x60] sm:$0xff] }
   0xa   :  { %310 = vmatprep.subr.bf16.mxu1 %v360_v3  ;;  %v320_v26 = vpack.c.bf16 %v119_v25, %v118_v24  ;;  %v121_v28 = vld [vmem:[%s478_s3 + $0x68] sm:$0xff]  ;;  %v122_v30 = vld [vmem:[%s478_s3 + $0x70] sm:$0xff]  ;;  %v123_v31 = vld [vmem:[%s478_s3 + $0x78] sm:$0xff] }
   0xb   :  { %261 = vmatmul.mubr.msk.f32.vlgmr.msra.gmra.mrb[0].mxu0 %vm33_vm1, %v21_v16  ;;  %v323_v29 = vpack.c.bf16 %v121_v28, %v120_v27  ;;  %v326_v32 = vpack.c.bf16 %v123_v31, %v122_v30  ;;  %v227_v33 = vld [vmem:[%s477_s2] ss:$0 sm:$0xff]  ;;  %s363_s2 = smov [#allocation2]  }
   0xc   :  { %v229_v38 = vld [vmem:[%s479_s4] ss:$0 sm:$0xff]  ;;  %s219_s3 = sshll.u32 %s363_s2, 4  ;;  %s220_s3 = int_to_ptr.vmem [resolvable:$true] %s219_s3 }
   0xd   :  { %312 = vmatpush3.bf16.msra.mxu1 %v311_v17  ;;  %s336_s4 = scalar_lea.vmem %s220_s3, 128  ;;  %p341_p1 = scmp.lt.s32.totalorder %s220_s3, %s220_s3 }
   0xe   :  { %313 = vmatprep.subr.bf16.mxu1 %v360_v3  ;;  %p337_p0 = scmp.ne.s32.totalorder %s220_s3, %s336_s4  ;;  %p342_p2 = scmp.lt.s32.totalorder %s336_s4, %s336_s4 }
  0x10   :  { %p343_p3 = por %p342_p2, %p341_p1 }
  0x11   :  { %315 = vmatpush3.bf16.msra.mxu1 %v314_v20 }
  0x12   :  { %316 = vmatprep.subr.bf16.mxu1 %v360_v3  ;;  %p344_p4 = pnand %p343_p3, %p337_p0 }
  0x15   :  { %318 = vmatpush3.bf16.msra.mxu1 %v317_v23 }
  0x16   :  { %319 = vmatprep.subr.bf16.mxu1 %v360_v3 }
  0x19   :  { %321 = vmatpush3.bf16.msra.mxu1 %v320_v26 }
  0x1a   :  { %322 = vmatprep.subr.bf16.mxu1 %v360_v3 }
  0x1d   :  { %324 = vmatpush3.bf16.msra.mxu1 %v323_v29 }
  0x1e   :  { %325 = vmatprep.subr.bf16.mxu1 %v360_v3 }
  0x21   :  { %327 = vmatpush3.bf16.msra.mxu1 %v326_v32 }
  0xde   :  { %v103_v34 = vpop.f32.mrb[0].mxu0 }
  0xdf   :  { %v104_v35 = vadd.f32 %v227_v33, %v103_v34  ;;  %v262_v36 = vpop.f32.mrb[1].mxu0 }
  0xe1   :  { %v107_v37 = vmax.f32 %v104_v35, 0.0 }
  0xe3   :  { %296 = vmatmul.mubr.f32.vlgmr.msra.gmra.mrb[0].mxu1 %v107_v37 }
 0x1b6   :  { %v197_v39 = vpop.f32.mrb[0].mxu1 }
 0x1b7   :  { %v198_v40 = vadd.f32 %v229_v38, %v197_v39  ;;  %v297_v41 = vpop.f32.mrb[1].mxu1 }
 0x1b9   :  { %v201_v42 = vand.u32 2147483647, %v198_v40  ;;  %vm205_vm3 = vcmp.ge.f32.partialorder %v198_v40, 0.0 }
 0x1bb   :  { %v202_v43 = vsub.f32 0.0, %v201_v42 }
 0x1bd   :  { %v203_v44 = vmul.f32 1.442695, %v202_v43 }
 0x1bf   :  { %332 = vpow2.f32 %v203_v44 }
 0x1c9   :  { %v333_v45 = vpop.eup %332 }
 0x1ca   :  { %v206_v46 = vadd.f32 1.0, %v333_v45 }
 0x1cc   :  { %334 = vrcp.f32 %v206_v46 }
 0x1d6   :  { %v335_v47 = vpop.eup %334 }
 0x1d7   :  { %v209_v48 = vmul.f32 %v335_v47, %v333_v45 }
 0x1d9   :  { %v210_v49 = vsel %vm205_vm3, %v335_v47, %v209_v48 }
 0x1da   :  { %212 = vst.msk [vmem:[#allocation2] sm:$0xff] %vm211_vm2, %v210_v49 }
 0x1db   :  { %347 = shalt.err (!%p344_p4)
}
 0x1dc   :  { %s348_s13 = scalar_lea.hbm %s480_s5, 128 }
 0x1dd   :  { %p349_p5 = scmp.ne.s32.totalorder %s480_s5, %s348_s13  ;;  %p352_p6 = scmp.lt.u32.totalorder %s348_s13, %s480_s5 }
 0x1df   :  { %p354_p7 = pnand %p352_p6, %p349_p5 }
 0x1e1   :  { %357 = shalt.err (!%p354_p7)
}
 0x1e2   :  { %222 = dma.vmem_to_hbm [thread:$0]  %s220_s3, 128, %s480_s5, [#allocation3]  }
 0x1e3   :  { %358 = dma.done.wait [#allocation3], 128  }
 0x1e4   :  { %359 = vsyncadd [#allocation3], 4294967168 }
 0x1e5   :  { %226 = vsyncpa [#allocation3], 1 }

</bundles_post_ra>
